<compile_context>
chip_gen: v7x
topology: tpu7x:2x2x1
jax: 0.10.0
libtpu: 0.0.40
codegen_flags: <defaults>
</compile_context>

<pallas_src>
import functools

import jax
import jax.numpy as jnp
from jax import lax
from jax.experimental import pallas as pl
from jax.experimental.pallas import tpu as pltpu


def _round_up(a, b):
    return (a + b - 1) // b * b


def _dwsep_kernel(x_hbm, dw_ref, pw_ref, o_ref, xbuf, dwacc, copy_sem, *,
                  kh, kw, stride, dilation, th, th_in, wo, mxu_dtype):
    """Grid = (B, nH, nCout).

    x_hbm  : (B, Hp, Wp, Cp)   padded input, left in HBM; halo rows DMA'd manually
    dw_ref : (kh, kw, Cp)      depthwise weights (VMEM resident, constant index_map)
    pw_ref : (Cp, TC)          pointwise weight tile (resident across b / h tiles)
    o_ref  : (1, th, wo, TC)   lane-dense output tile
    xbuf   : (th_in, Wp, Cp)   VMEM scratch: haloed input rows for this h-tile
    dwacc  : (th, wo, Cp) f32  VMEM scratch: depthwise result, reused across Cout tiles
    """
    b = pl.program_id(0)
    hi = pl.program_id(1)
    jc = pl.program_id(2)

    # Depthwise stage depends only on (b, hi): fetch + compute once per h-tile,
    # reuse the result for every Cout tile (Cout axis is innermost / "arbitrary").
    @pl.when(jc == 0)
    def _():
        row_start = pl.multiple_of(hi * (th * stride), th * stride)
        # Rows [row_start, row_start + th_in) x full W x full C is a contiguous HBM chunk.
        cp = pltpu.make_async_copy(x_hbm.at[b, pl.ds(row_start, th_in)], xbuf, copy_sem)
        cp.start()
        cp.wait()

        cin = xbuf.shape[-1]
        acc = jnp.zeros((th, wo, cin), dtype=jnp.float32)
        span_h = (th - 1) * stride + 1
        span_w = (wo - 1) * stride + 1
        for i in range(kh):          # static kh*kw tap loop
            for j in range(kw):
                h0 = i * dilation
                w0 = j * dilation
                if stride == 1:
                    sl = xbuf[pl.ds(h0, th), pl.ds(w0, wo), :]
                else:
                    win = xbuf[pl.ds(h0, span_h), pl.ds(w0, span_w), :]
                    sl = lax.slice(win, (0, 0, 0), win.shape, (stride, stride, 1))
                acc = acc + sl.astype(jnp.float32) * dw_ref[i, j, :].astype(jnp.float32)
        dwacc[...] = acc

    # Pointwise 1x1 conv == matmul over the channel axis on the MXU.
    # wo is a multiple of 8, Cp/TC multiples of 128 -> layout-preserving reshape,
    # unmasked lane-dense stores.
    lhs = dwacc[...].reshape(th * wo, -1).astype(mxu_dtype)
    rhs = pw_ref[...].astype(mxu_dtype)
    out = jnp.dot(lhs, rhs, preferred_element_type=jnp.float32)
    o_ref[0] = out.reshape(th, wo, -1).astype(o_ref.dtype)


def depthwise_separable_conv2d(x_nchw, dw_weight, pw_weight, *, stride=1, padding=0,
                               dilation=1, th_tile=8, tc_tile=128):
    """Pallas implementation of DepthwiseSeparableConv2d.forward.

    x_nchw   : (B, Cin, H, W)
    dw_weight: (Cin, 1, KH, KW)   (PyTorch depthwise conv weight, groups=Cin)
    pw_weight: (Cout, Cin, 1, 1)  (PyTorch pointwise conv weight)
    returns  : (B, Cout, Ho, Wo)
    """
    b, cin, h, w = x_nchw.shape
    cout = pw_weight.shape[0]
    kh, kw = dw_weight.shape[2], dw_weight.shape[3]

    h_out = (h + 2 * padding - dilation * (kh - 1) - 1) // stride + 1
    w_out = (w + 2 * padding - dilation * (kw - 1) - 1) // stride + 1

    # ---- tiling / lane-density choices ------------------------------------
    th = th_tile                                   # output rows per grid step
    h_out_p = _round_up(h_out, th)                 # Ho padded so row tiles divide evenly
    w_out_p = _round_up(w_out, 8)                  # sublane-aligned Wo
    cin_p = _round_up(cin, 128)                    # lane-dense channels
    cout_p = _round_up(cout, tc_tile)
    tc = min(tc_tile, cout_p)

    th_in = (th - 1) * stride + dilation * (kh - 1) + 1   # haloed input rows per tile
    pad_b = max(0, (h_out_p - 1) * stride + dilation * (kh - 1) + 1 - (h + padding))
    pad_r = max(0, (w_out_p - 1) * stride + dilation * (kw - 1) + 1 - (w + padding))

    # ---- glue (plain JAX): layout change + one fused zero-pad --------------
    x_nhwc = jnp.transpose(x_nchw, (0, 2, 3, 1))
    x_pad = jnp.pad(x_nhwc,
                    ((0, 0), (padding, pad_b), (padding, pad_r), (0, cin_p - cin)))
    hp, wp = x_pad.shape[1], x_pad.shape[2]

    dw = jnp.transpose(dw_weight[:, 0, :, :], (1, 2, 0))             # (KH, KW, Cin)
    dw = jnp.pad(dw, ((0, 0), (0, 0), (0, cin_p - cin)))
    pw = jnp.transpose(pw_weight[:, :, 0, 0], (1, 0))                # (Cin, Cout)
    pw = jnp.pad(pw, ((0, cin_p - cin), (0, cout_p - cout)))

    # bf16 inputs to the MXU when the model runs in bf16; f32 accumulation always.
    mxu_dtype = jnp.bfloat16 if x_nchw.dtype == jnp.bfloat16 else jnp.float32

    n_h = h_out_p // th
    n_c = cout_p // tc

    kernel = functools.partial(
        _dwsep_kernel, kh=kh, kw=kw, stride=stride, dilation=dilation,
        th=th, th_in=th_in, wo=w_out_p, mxu_dtype=mxu_dtype)

    out_nhwc = pl.pallas_call(
        kernel,
        out_shape=jax.ShapeDtypeStruct((b, h_out_p, w_out_p, cout_p), x_nchw.dtype),
        grid_spec=pltpu.PrefetchScalarGridSpec(
            num_scalar_prefetch=0,
            grid=(b, n_h, n_c),
            in_specs=[
                pl.BlockSpec(memory_space=pl.ANY),                         # x: stays in HBM
                pl.BlockSpec((kh, kw, cin_p), lambda bb, hi, jc: (0, 0, 0)),
                pl.BlockSpec((cin_p, tc), lambda bb, hi, jc: (0, jc)),
            ],
            out_specs=pl.BlockSpec((1, th, w_out_p, tc),
                                   lambda bb, hi, jc: (bb, hi, 0, jc)),
            scratch_shapes=[
                pltpu.VMEM((th_in, wp, cin_p), x_nchw.dtype),   # haloed input rows
                pltpu.VMEM((th, w_out_p, cin_p), jnp.float32),  # depthwise accumulator
                pltpu.SemaphoreType.DMA,                        # halo DMA semaphore
            ],
        ),
        compiler_params=pltpu.CompilerParams(
            dimension_semantics=("parallel", "parallel", "arbitrary"),
            vmem_limit_bytes=48 * 1024 * 1024,   # fits v7x's 64 MiB with headroom
        ),
    )(x_pad, dw, pw)

    out = out_nhwc[:, :h_out, :w_out, :cout]      # strip Ho/Wo/Cout padding
    return jnp.transpose(out, (0, 3, 1, 2))       # back to NCHW


def _reference(x_nchw, dw_weight, pw_weight, *, stride, padding, dilation):
    """Pure-JAX reference (lax conv) matching PyTorch Conv2d semantics."""
    cin = x_nchw.shape[1]
    y = lax.conv_general_dilated(
        x_nchw, dw_weight,
        window_strides=(stride, stride),
        padding=((padding, padding), (padding, padding)),
        rhs_dilation=(dilation, dilation),
        dimension_numbers=("NCHW", "OIHW", "NCHW"),
        feature_group_count=cin)
    y = lax.conv_general_dilated(
        y, pw_weight,
        window_strides=(1, 1),
        padding=((0, 0), (0, 0)),
        dimension_numbers=("NCHW", "OIHW", "NCHW"))
    return y


if __name__ == "__main__":
    B, Cin, Cout, H, W = 2, 4, 8, 16, 16
    K, STRIDE, PAD, DIL = 3, 1, 1, 1

    key = jax.random.PRNGKey(0)
    kx, kd, kp = jax.random.split(key, 3)

    x = jax.random.normal(kx, (B, Cin, H, W), dtype=jnp.float32)
    dw_weight = jax.random.normal(kd, (Cin, 1, K, K), dtype=jnp.float32) * 0.1
    pw_weight = jax.random.normal(kp, (Cout, Cin, 1, 1), dtype=jnp.float32) * 0.1

    out = depthwise_separable_conv2d(x, dw_weight, pw_weight,
                                     stride=STRIDE, padding=PAD, dilation=DIL)
    out = jax.block_until_ready(out)

    ref = _reference(x, dw_weight, pw_weight, stride=STRIDE, padding=PAD, dilation=DIL)
    assert out.shape == ref.shape, (out.shape, ref.shape)
    assert jnp.allclose(out, ref, atol=1e-4, rtol=1e-4), float(jnp.abs(out - ref).max())

    print("KERNEL_OK")
</pallas_src>

<mosaic_0001>
module attributes {stable_mosaic.version = 11 : i64} {
  func.func @_dwsep_kernel(%arg0: i32, %arg1: i32, %arg2: i32, %arg3: memref<2x18x18x128xf32, #tpu.memory_space<any>>, %arg4: memref<3x3x128xf32, #tpu.memory_space<vmem>>, %arg5: memref<128x128xf32, #tpu.memory_space<vmem>>, %arg6: memref<1x8x16x128xf32, #tpu.memory_space<vmem>>, %arg7: memref<10x18x128xf32, #tpu.memory_space<vmem>>, %arg8: memref<8x16x128xf32, #tpu.memory_space<vmem>>, %arg9: memref<!tpu.dma_semaphore, #tpu.memory_space<semaphore_mem>>) attributes {dimension_semantics = [#tpu.dimension_semantics<parallel>, #tpu.dimension_semantics<parallel>, #tpu.dimension_semantics<arbitrary>], iteration_bounds = array<i64: 2, 2, 1>, scalar_prefetch = 0 : i64, scratch_operands = 3 : i64, tpu.core_type = #tpu.core_type<tc>, window_params = [{}, {pipeline_mode = #tpu.pipeline_mode<synchronous>, transform_indices = @transform_1, window_bounds = array<i64: 3, 3, 128>}, {transform_indices = @transform_2, window_bounds = array<i64: 128, 128>}, {transform_indices = @transform_3, window_bounds = array<i64: 1, 8, 16, 128>}]} {
    %c0_i32 = arith.constant 0 : i32
    %0 = arith.cmpi eq, %arg2, %c0_i32 : i32
    %1 = arith.extui %0 : i1 to i32
    %c0_i32_0 = arith.constant 0 : i32
    %2 = arith.cmpi ne, %1, %c0_i32_0 : i32
    scf.if %2 {
      %c8_i32 = arith.constant 8 : i32
      %11 = arith.muli %arg1, %c8_i32 : i32
      %12 = tpu.assume_multiple %11, 8 : i32
      %c0_i32_9 = arith.constant 0 : i32
      %c0_i32_10 = arith.constant 0 : i32
      %13 = tpu.memref_slice %arg3[%arg0, %12, %c0_i32_9, %c0_i32_10] : memref<2x18x18x128xf32, #tpu.memory_space<any>> -> memref<1x10x18x128xf32, #tpu.memory_space<any>>
      %14 = tpu.memref_squeeze %13 : memref<1x10x18x128xf32, #tpu.memory_space<any>> -> memref<10x18x128xf32, #tpu.memory_space<any>>
      tpu.enqueue_dma source(%14 : memref<10x18x128xf32, #tpu.memory_space<any>>) target(%arg7 : memref<10x18x128xf32, #tpu.memory_space<vmem>>) target_semaphore(%arg9 : memref<!tpu.dma_semaphore, #tpu.memory_space<semaphore_mem>>)
      %c0_i32_11 = arith.constant 0 : i32
      %c0_i32_12 = arith.constant 0 : i32
      %15 = tpu.memref_slice %arg3[%arg0, %12, %c0_i32_11, %c0_i32_12] : memref<2x18x18x128xf32, #tpu.memory_space<any>> -> memref<1x10x18x128xf32, #tpu.memory_space<any>>
      %16 = tpu.memref_squeeze %15 : memref<1x10x18x128xf32, #tpu.memory_space<any>> -> memref<10x18x128xf32, #tpu.memory_space<any>>
      tpu.wait_dma2 semaphore(%arg9 : memref<!tpu.dma_semaphore, #tpu.memory_space<semaphore_mem>>) src(%16 : memref<10x18x128xf32, #tpu.memory_space<any>>) dst(%arg7 : memref<10x18x128xf32, #tpu.memory_space<vmem>>)
      %cst_13 = arith.constant 0.000000e+00 : f32
      %17 = vector.broadcast %cst_13 : f32 to vector<8x16x128xf32>
      %c0_14 = arith.constant 0 : index
      %c0_15 = arith.constant 0 : index
      %c0_16 = arith.constant 0 : index
      %18 = vector.load %arg7[%c0_14, %c0_15, %c0_16] : memref<10x18x128xf32, #tpu.memory_space<vmem>>, vector<8x16x128xf32>
      %c0_17 = arith.constant 0 : index
      %c0_18 = arith.constant 0 : index
      %c0_19 = arith.constant 0 : index
      %19 = vector.load %arg4[%c0_17, %c0_18, %c0_19] : memref<3x3x128xf32, #tpu.memory_space<vmem>>, vector<1x1x128xf32>
      %20 = vector.shape_cast %19 : vector<1x1x128xf32> to vector<128xf32>
      %21 = vector.shape_cast %20 : vector<128xf32> to vector<1x1x128xf32>
      %22 = vector.broadcast %21 : vector<1x1x128xf32> to vector<8x16x128xf32>
      %23 = arith.mulf %18, %22 : vector<8x16x128xf32>
      %24 = arith.addf %17, %23 : vector<8x16x128xf32>
      %c0_20 = arith.constant 0 : index
      %c1 = arith.constant 1 : index
      %c0_21 = arith.constant 0 : index
      %25 = vector.load %arg7[%c0_20, %c1, %c0_21] : memref<10x18x128xf32, #tpu.memory_space<vmem>>, vector<8x16x128xf32>
      %c0_22 = arith.constant 0 : index
      %c1_23 = arith.constant 1 : index
      %c0_24 = arith.constant 0 : index
      %26 = vector.load %arg4[%c0_22, %c1_23, %c0_24] : memref<3x3x128xf32, #tpu.memory_space<vmem>>, vector<1x1x128xf32>
      %27 = vector.shape_cast %26 : vector<1x1x128xf32> to vector<128xf32>
      %28 = vector.shape_cast %27 : vector<128xf32> to vector<1x1x128xf32>
      %29 = vector.broadcast %28 : vector<1x1x128xf32> to vector<8x16x128xf32>
      %30 = arith.mulf %25, %29 : vector<8x16x128xf32>
      %31 = arith.addf %24, %30 : vector<8x16x128xf32>
      %c0_25 = arith.constant 0 : index
      %c2 = arith.constant 2 : index
      %c0_26 = arith.constant 0 : index
      %32 = vector.load %arg7[%c0_25, %c2, %c0_26] : memref<10x18x128xf32, #tpu.memory_space<vmem>>, vector<8x16x128xf32>
      %c0_27 = arith.constant 0 : index
      %c2_28 = arith.constant 2 : index
      %c0_29 = arith.constant 0 : index
      %33 = vector.load %arg4[%c0_27, %c2_28, %c0_29] : memref<3x3x128xf32, #tpu.memory_space<vmem>>, vector<1x1x128xf32>
      %34 = vector.shape_cast %33 : vector<1x1x128xf32> to vector<128xf32>
      %35 = vector.shape_cast %34 : vector<128xf32> to vector<1x1x128xf32>
      %36 = vector.broadcast %35 : vector<1x1x128xf32> to vector<8x16x128xf32>
      %37 = arith.mulf %32, %36 : vector<8x16x128xf32>
      %38 = arith.addf %31, %37 : vector<8x16x128xf32>
      %c1_30 = arith.constant 1 : index
      %c0_31 = arith.constant 0 : index
      %c0_32 = arith.constant 0 : index
      %39 = vector.load %arg7[%c1_30, %c0_31, %c0_32] : memref<10x18x128xf32, #tpu.memory_space<vmem>>, vector<8x16x128xf32>
      %c1_33 = arith.constant 1 : index
      %c0_34 = arith.constant 0 : index
      %c0_35 = arith.constant 0 : index
      %40 = vector.load %arg4[%c1_33, %c0_34, %c0_35] : memref<3x3x128xf32, #tpu.memory_space<vmem>>, vector<1x1x128xf32>
      %41 = vector.shape_cast %40 : vector<1x1x128xf32> to vector<128xf32>
      %42 = vector.shape_cast %41 : vector<128xf32> to vector<1x1x128xf32>
      %43 = vector.broadcast %42 : vector<1x1x128xf32> to vector<8x16x128xf32>
      %44 = arith.mulf %39, %43 : vector<8x16x128xf32>
      %45 = arith.addf %38, %44 : vector<8x16x128xf32>
      %c1_36 = arith.constant 1 : index
      %c1_37 = arith.constant 1 : index
      %c0_38 = arith.constant 0 : index
      %46 = vector.load %arg7[%c1_36, %c1_37, %c0_38] : memref<10x18x128xf32, #tpu.memory_space<vmem>>, vector<8x16x128xf32>
      %c1_39 = arith.constant 1 : index
      %c1_40 = arith.constant 1 : index
      %c0_41 = arith.constant 0 : index
      %47 = vector.load %arg4[%c1_39, %c1_40, %c0_41] : memref<3x3x128xf32, #tpu.memory_space<vmem>>, vector<1x1x128xf32>
      %48 = vector.shape_cast %47 : vector<1x1x128xf32> to vector<128xf32>
      %49 = vector.shape_cast %48 : vector<128xf32> to vector<1x1x128xf32>
      %50 = vector.broadcast %49 : vector<1x1x128xf32> to vector<8x16x128xf32>
      %51 = arith.mulf %46, %50 : vector<8x16x128xf32>
      %52 = arith.addf %45, %51 : vector<8x16x128xf32>
      %c1_42 = arith.constant 1 : index
      %c2_43 = arith.constant 2 : index
      %c0_44 = arith.constant 0 : index
      %53 = vector.load %arg7[%c1_42, %c2_43, %c0_44] : memref<10x18x128xf32, #tpu.memory_space<vmem>>, vector<8x16x128xf32>
      %c1_45 = arith.constant 1 : index
      %c2_46 = arith.constant 2 : index
      %c0_47 = arith.constant 0 : index
      %54 = vector.load %arg4[%c1_45, %c2_46, %c0_47] : memref<3x3x128xf32, #tpu.memory_space<vmem>>, vector<1x1x128xf32>
      %55 = vector.shape_cast %54 : vector<1x1x128xf32> to vector<128xf32>
      %56 = vector.shape_cast %55 : vector<128xf32> to vector<1x1x128xf32>
      %57 = vector.broadcast %56 : vector<1x1x128xf32> to vector<8x16x128xf32>
      %58 = arith.mulf %53, %57 : vector<8x16x128xf32>
      %59 = arith.addf %52, %58 : vector<8x16x128xf32>
      %c2_48 = arith.constant 2 : index
      %c0_49 = arith.constant 0 : index
      %c0_50 = arith.constant 0 : index
      %60 = vector.load %arg7[%c2_48, %c0_49, %c0_50] : memref<10x18x128xf32, #tpu.memory_space<vmem>>, vector<8x16x128xf32>
      %c2_51 = arith.constant 2 : index
      %c0_52 = arith.constant 0 : index
      %c0_53 = arith.constant 0 : index
      %61 = vector.load %arg4[%c2_51, %c0_52, %c0_53] : memref<3x3x128xf32, #tpu.memory_space<vmem>>, vector<1x1x128xf32>
      %62 = vector.shape_cast %61 : vector<1x1x128xf32> to vector<128xf32>
      %63 = vector.shape_cast %62 : vector<128xf32> to vector<1x1x128xf32>
      %64 = vector.broadcast %63 : vector<1x1x128xf32> to vector<8x16x128xf32>
      %65 = arith.mulf %60, %64 : vector<8x16x128xf32>
      %66 = arith.addf %59, %65 : vector<8x16x128xf32>
      %c2_54 = arith.constant 2 : index
      %c1_55 = arith.constant 1 : index
      %c0_56 = arith.constant 0 : index
      %67 = vector.load %arg7[%c2_54, %c1_55, %c0_56] : memref<10x18x128xf32, #tpu.memory_space<vmem>>, vector<8x16x128xf32>
      %c2_57 = arith.constant 2 : index
      %c1_58 = arith.constant 1 : index
      %c0_59 = arith.constant 0 : index
      %68 = vector.load %arg4[%c2_57, %c1_58, %c0_59] : memref<3x3x128xf32, #tpu.memory_space<vmem>>, vector<1x1x128xf32>
      %69 = vector.shape_cast %68 : vector<1x1x128xf32> to vector<128xf32>
      %70 = vector.shape_cast %69 : vector<128xf32> to vector<1x1x128xf32>
      %71 = vector.broadcast %70 : vector<1x1x128xf32> to vector<8x16x128xf32>
      %72 = arith.mulf %67, %71 : vector<8x16x128xf32>
      %73 = arith.addf %66, %72 : vector<8x16x128xf32>
      %c2_60 = arith.constant 2 : index
      %c2_61 = arith.constant 2 : index
      %c0_62 = arith.constant 0 : index
      %74 = vector.load %arg7[%c2_60, %c2_61, %c0_62] : memref<10x18x128xf32, #tpu.memory_space<vmem>>, vector<8x16x128xf32>
      %c2_63 = arith.constant 2 : index
      %c2_64 = arith.constant 2 : index
      %c0_65 = arith.constant 0 : index
      %75 = vector.load %arg4[%c2_63, %c2_64, %c0_65] : memref<3x3x128xf32, #tpu.memory_space<vmem>>, vector<1x1x128xf32>
      %76 = vector.shape_cast %75 : vector<1x1x128xf32> to vector<128xf32>
      %77 = vector.shape_cast %76 : vector<128xf32> to vector<1x1x128xf32>
      %78 = vector.broadcast %77 : vector<1x1x128xf32> to vector<8x16x128xf32>
      %79 = arith.mulf %74, %78 : vector<8x16x128xf32>
      %80 = arith.addf %73, %79 : vector<8x16x128xf32>
      %c0_66 = arith.constant 0 : index
      %c0_67 = arith.constant 0 : index
      %c0_68 = arith.constant 0 : index
      %81 = vector.load %arg8[%c0_66, %c0_67, %c0_68] : memref<8x16x128xf32, #tpu.memory_space<vmem>>, vector<8x16x128xf32>
      tpu.vector_store %arg8[%c0_66, %c0_67, %c0_68], %80 {strides = array<i32>} : memref<8x16x128xf32, #tpu.memory_space<vmem>>, vector<8x16x128xf32>,
    } else {
    }
    %c0 = arith.constant 0 : index
    %c0_1 = arith.constant 0 : index
    %c0_2 = arith.constant 0 : index
    %3 = vector.load %arg8[%c0, %c0_1, %c0_2] : memref<8x16x128xf32, #tpu.memory_space<vmem>>, vector<8x16x128xf32>
    %4 = vector.shape_cast %3 : vector<8x16x128xf32> to vector<128x128xf32>
    %c0_3 = arith.constant 0 : index
    %c0_4 = arith.constant 0 : index
    %5 = vector.load %arg5[%c0_3, %c0_4] : memref<128x128xf32, #tpu.memory_space<vmem>>, vector<128x128xf32>
    %cst = arith.constant dense<0.000000e+00> : vector<128x128xf32>
    %6 = tpu.matmul %4, %5, %cst {dimension_numbers = #tpu.dot_dimension_numbers<[1], [0], [0], [1], [0, 0, 1, 1], [], []>} : vector<128x128xf32>, vector<128x128xf32>, vector<128x128xf32> -> vector<128x128xf32>
    %7 = vector.shape_cast %6 : vector<128x128xf32> to vector<8x16x128xf32>
    %c0_5 = arith.constant 0 : index
    %c0_6 = arith.constant 0 : index
    %c0_7 = arith.constant 0 : index
    %c0_8 = arith.constant 0 : index
    %8 = vector.load %arg6[%c0_5, %c0_6, %c0_7, %c0_8] : memref<1x8x16x128xf32, #tpu.memory_space<vmem>>, vector<1x8x16x128xf32>
    %9 = vector.shape_cast %8 : vector<1x8x16x128xf32> to vector<8x16x128xf32>
    %10 = vector.shape_cast %7 : vector<8x16x128xf32> to vector<1x8x16x128xf32>
    tpu.vector_store %arg6[%c0_5, %c0_6, %c0_7, %c0_8], %10 {strides = array<i32>} : memref<1x8x16x128xf32, #tpu.memory_space<vmem>>, vector<1x8x16x128xf32>,
    return
  }
  func.func @transform_1(%arg0: i32, %arg1: i32, %arg2: i32) -> (i32, i32, i32) {
    %c0_i32 = arith.constant 0 : i32
    %c0_i32_0 = arith.constant 0 : i32
    %c0_i32_1 = arith.constant 0 : i32
    %c0_i32_2 = arith.constant 0 : i32
    return %c0_i32, %c0_i32_0, %c0_i32_1 : i32, i32, i32
  }
  func.func @transform_2(%arg0: i32, %arg1: i32, %arg2: i32) -> (i32, i32) {
    %c0_i32 = arith.constant 0 : i32
    %c0_i32_0 = arith.constant 0 : i32
    return %c0_i32, %arg2 : i32, i32
  }
  func.func @transform_3(%arg0: i32, %arg1: i32, %arg2: i32) -> (i32, i32, i32, i32) {
    %c0_i32 = arith.constant 0 : i32
    %c0_i32_0 = arith.constant 0 : i32
    return %arg0, %arg1, %c0_i32, %arg2 : i32, i32, i32, i32
  }
}

</mosaic_0001>

<bundles_post_ra>
// kernel: tpu_custom_call.1
= control target key start
LH: loop header
LB: loop body
LE: loop exit
PB: predicated region body
PF: predicated region fallthrough
CT: control target
= control target key end

     0   :  { %8 = vsyncpa [#allocation6], 0  ;;  %s2157_s0 = inlined_call_operand.vmem [shape: f32[2,18,18,128], index: 0, kind: input, shape index: {}]   ;;  %s2158_s1 = inlined_call_operand.vmem [shape: f32[3,3,128], index: 1, kind: input, shape index: {}]   ;;  %s2159_s2 = inlined_call_operand.vmem [shape: f32[128,128], index: 2, kind: input, shape index: {}]   ;;  %s2160_s3 = inlined_call_operand.hbm [shape: f32[2,16,16,128], index: 3, kind: output, shape index: {}]  }
   0x1   :  { %10 = vsyncpa [#allocation6 + $0x1], 0  ;;  %s1492_s12 = smov 0   ;;  %s1494_s13 = smov 0  }
   0x2   :  { %s1496_s14 = smov 0   ;;  %s1498_s15 = smov 0  }
   0x3   :  { %s1500_s16 = smov 0   ;;  %s1502_s17 = smov 0  }
   0x4   :  { %s1504_s18 = smov 0   ;;  %s1506_s19 = smov 0  }
   0x5 LB: > { %s1120_s20 = sadd.s32 4294967295, %s1467_s19   ;;  %s1121_s21 = sadd.s32 4294967294, %s1467_s19   ;;  %s1467_s19 = sphi %s1506_s19, %s16_s19   ;;  %s1463_s18 = sphi %s1504_s18, %s2172_s18   ;;  %s1459_s17 = sphi %s1502_s17, %s2171_s17   ;;  %s1455_s16 = sphi %s1500_s16, %s2170_s16   ;;  %s1451_s15 = sphi %s1498_s15, %s2169_s15   ;;  %s1447_s14 = sphi %s1496_s14, %s2168_s14   ;;  %s1443_s13 = sphi %s1494_s13, %s2167_s13   ;;  %s1439_s12 = sphi %s1492_s12, %s2166_s12  }
   0x6   : > { %s31_s22 = sadd.s32 1, %s1459_s17  ;;  %s35_s23 = sadd.s32 1, %s1463_s18 }
   0x7   : > { %p33_p0 = scmp.ge.s32.totalorder %s31_s22, 2  ;;  %p103_p1 = scmp.ne.s32.totalorder %s1447_s14, %s1443_s13 }
   0x8   : > { %p104_p2 = scmp.eq.s32.totalorder %s1120_s20, 3  ;;  %p109_p5 = scmp.ne.s32.totalorder %s1443_s13, %s1439_s12 }
   0x9   : > { %s2174_s22 = smov (%p33_p0, %s31_s22), 0  ;;  %s2176_s23 = smov (!%p33_p0, %s35_s23), %s1463_s18 }
   0xa   : > { %s87_s24 = ssub.s32 %s1459_s17, %s2174_s22  ;;  %p1543_p3 = por %p104_p2, %p103_p1 }
   0xb   : > { %p37_p4 = scmp.ge.s32.totalorder %s2176_s23, 2  ;;  %p110_p6 = scmp.eq.s32.totalorder %s1121_s21, 3 }
   0xc   : > { %p1124_p7 = scmp.ge.s32.totalorder %s1467_s19, 1  ;;  %p138_p9 = scmp.lt.s32.totalorder %s1467_s19, 5 }
   0xd   : > { %s2178_s23 = smov (%p37_p4, %s2176_s23), 0  ;;  %p1552_p8 = por %p110_p6, %p109_p5 }
   0xe   : > { %s86_s27 = ssub.s32 %s1463_s18, %s2178_s23  ;;  %s93_s28 = sadd.s32 1, %s1447_s14 }
   0xf   : > { %s88_s29 = sor.u32 %s87_s24, %s86_s27  ;;  %p139_p10 = pnand %p1124_p7, %p138_p9 }
  0x10   : > { %p91_p11 = scmp.eq.s32.totalorder %s88_s29, 0 }
  0x11   : > { %142 = sbr.rel (%p139_p10) target bundleno = 364 (0x16c), region = 28 }
  0x12   : > { %s1561_s30 = scalar_select %p91_p11, %s1447_s14, %s93_s28  }
  0x18   : > { %s156_s4 = sand.u32 1, %s1443_s13   ;;  %s1127_s5 = smul.u32 192, %s1451_s15 }
  0x19   : > { %s1567_s6 = sshll.u32 %s156_s4, 7  ;;  %s170_s7 = smul.u32 432, %s1455_s16 }
  0x1a   : > { %s1606_s20 = scalar_lea.vmem [#allocation5], %s1567_s6 }
  0x1b   : > { %s171_s8 = sadd.s32 %s1127_s5, %s170_s7 }
  0x1c   : > { %s1573_s11 = scalar_lea.vmem %s2157_s0, %s171_s8 }
  0x1d   : > { %v228_v0 = vld [vmem:[%s1573_s11] sm:$0xff]  ;;  %v230_v1 = vld [vmem:[%s1573_s11 + $0x8] sm:$0xff]  ;;  %v232_v2 = vld [vmem:[%s1573_s11 + $0x18] sm:$0xff] }
  0x1e   : > { %229 = vst [vmem:[#allocation2] sm:$0xff] %v228_v0  ;;  %231 = vst [vmem:[#allocation2 + $0x8] sm:$0xff] %v230_v1  ;;  %v234_v3 = vld [vmem:[%s1573_s11 + $0x20] sm:$0xff]  ;;  %v236_v4 = vld [vmem:[%s1573_s11 + $0x30] sm:$0xff] }
  0x1f   : > { %233 = vst [vmem:[#allocation2 + $0x18] sm:$0xff] %v232_v2  ;;  %v238_v5 = vld [vmem:[%s1573_s11 + $0x38] sm:$0xff]  ;;  %235 = vst [vmem:[#allocation2 + $0x20] sm:$0xff] %v234_v3  ;;  %v240_v6 = vld [vmem:[%s1573_s11 + $0x48] sm:$0xff] }
  0x20   : > { %237 = vst [vmem:[#allocation2 + $0x30] sm:$0xff] %v236_v4  ;;  %239 = vst [vmem:[#allocation2 + $0x38] sm:$0xff] %v238_v5  ;;  %v242_v7 = vld [vmem:[%s1573_s11 + $0x50] sm:$0xff]  ;;  %v244_v8 = vld [vmem:[%s1573_s11 + $0x60] sm:$0xff] }
  0x21   : > { %241 = vst [vmem:[#allocation2 + $0x48] sm:$0xff] %v240_v6  ;;  %243 = vst [vmem:[#allocation2 + $0x50] sm:$0xff] %v242_v7  ;;  %v246_v9 = vld [vmem:[%s1573_s11 + $0x68] sm:$0xff]  ;;  %v248_v10 = vld [vmem:[%s1573_s11 + $0x78] sm:$0xff] }
  0x22   : > { %245 = vst [vmem:[#allocation2 + $0x60] sm:$0xff] %v244_v8  ;;  %v250_v11 = vld [vmem:[%s1573_s11 + $0x80] sm:$0xff]  ;;  %247 = vst [vmem:[#allocation2 + $0x68] sm:$0xff] %v246_v9  ;;  %v252_v12 = vld [vmem:[%s1573_s11 + $0x90] sm:$0xff] }
  0x23   : > { %249 = vst [vmem:[#allocation2 + $0x78] sm:$0xff] %v248_v10  ;;  %251 = vst [vmem:[#allocation2 + $0x80] sm:$0xff] %v250_v11  ;;  %v254_v13 = vld [vmem:[%s1573_s11 + $0x98] sm:$0xff]  ;;  %v256_v14 = vld [vmem:[%s1573_s11 + $0xa8] sm:$0xff] }
  0x24   : > { %253 = vst [vmem:[#allocation2 + $0x90] sm:$0xff] %v252_v12  ;;  %255 = vst [vmem:[#allocation2 + $0x98] sm:$0xff] %v254_v13  ;;  %v258_v15 = vld [vmem:[%s1573_s11 + $0xb0] sm:$0xff]  ;;  %v260_v16 = vld [vmem:[%s1573_s11 + $0xc0] sm:$0xff] }
  0x25   : > { %257 = vst [vmem:[#allocation2 + $0xa8] sm:$0xff] %v256_v14  ;;  %v262_v17 = vld [vmem:[%s1573_s11 + $0xc8] sm:$0xff]  ;;  %259 = vst [vmem:[#allocation2 + $0xb0] sm:$0xff] %v258_v15  ;;  %v264_v18 = vld [vmem:[%s1573_s11 + $0xd8] sm:$0xff] }
  0x26   : > { %261 = vst [vmem:[#allocation2 + $0xc0] sm:$0xff] %v260_v16  ;;  %263 = vst [vmem:[#allocation2 + $0xc8] sm:$0xff] %v262_v17  ;;  %v266_v19 = vld [vmem:[%s1573_s11 + $0xe0] sm:$0xff]  ;;  %v1128_v20 = vld [vmem:[%s1573_s11 + $0x10] sm:$0x3] }
  0x27   : > { %265 = vst [vmem:[#allocation2 + $0xd8] sm:$0xff] %v264_v18  ;;  %267 = vst [vmem:[#allocation2 + $0xe0] sm:$0xff] %v266_v19  ;;  %v1129_v21 = vld [vmem:[%s1573_s11 + $0x28] sm:$0x3]  ;;  %v1130_v22 = vld [vmem:[%s1573_s11 + $0x40] sm:$0x3] }
  0x28   : > { %278 = vst [vmem:[#allocation2 + $0x10] sm:$0x3] %v1128_v20  ;;  %v1131_v23 = vld [vmem:[%s1573_s11 + $0x58] sm:$0x3]  ;;  %280 = vst [vmem:[#allocation2 + $0x28] sm:$0x3] %v1129_v21 }
  0x29   : > { %282 = vst [vmem:[#allocation2 + $0x40] sm:$0x3] %v1130_v22  ;;  %284 = vst [vmem:[#allocation2 + $0x58] sm:$0x3] %v1131_v23  ;;  %v1132_v24 = vld [vmem:[%s1573_s11 + $0x70] sm:$0x3] }
  0x2a   : > { %v1133_v25 = vld [vmem:[%s1573_s11 + $0x88] sm:$0x3]  ;;  %v1134_v26 = vld [vmem:[%s1573_s11 + $0xa0] sm:$0x3]  ;;  %286 = vst [vmem:[#allocation2 + $0x70] sm:$0x3] %v1132_v24 }
  0x2b   : > { %288 = vst [vmem:[#allocation2 + $0x88] sm:$0x3] %v1133_v25  ;;  %290 = vst [vmem:[#allocation2 + $0xa0] sm:$0x3] %v1134_v26  ;;  %v1135_v27 = vld [vmem:[%s1573_s11 + $0xb8] sm:$0x3] }
  0x2c   : > { %v1136_v28 = vld [vmem:[%s1573_s11 + $0xd0] sm:$0x3]  ;;  %v1137_v29 = vld [vmem:[%s1573_s11 + $0xe8] sm:$0x3]  ;;  %292 = vst [vmem:[#allocation2 + $0xb8] sm:$0x3] %v1135_v27 }
  0x2d   : > { %294 = vst [vmem:[#allocation2 + $0xd0] sm:$0x3] %v1136_v28  ;;  %296 = vst [vmem:[#allocation2 + $0xe8] sm:$0x3] %v1137_v29 }
  0x2e   : > { %300 = vsyncadd [#allocation4], 2880 }
  0x2f   : > { %1431 = dma.done.wait [#allocation4], 2880 }
  0x30   : > { %1432 = vsyncadd [#allocation4], 4294964416  ;;  %v818_v30 = vld [vmem:[%s2159_s2] sm:$0xff]  ;;  %v819_v31 = vld [vmem:[%s2159_s2 + $0x8] sm:$0xff]  ;;  %s1161_s27 = sshll.u32 %s1451_s15, 4  ;;  %s1156_s28 = sshll.u32 %s1455_s16, 5 }
  0x31   : > { %v820_v32 = vld [vmem:[%s2159_s2 + $0x10] sm:$0xff]  ;;  %v1250_v33 = vpack.c.bf16 %v819_v31, %v818_v30  ;;  %v821_v34 = vld [vmem:[%s2159_s2 + $0x18] sm:$0xff]  ;;  %v822_v35 = vld [vmem:[%s2159_s2 + $0x20] sm:$0xff]  ;;  %s1010_s29 = sadd.s32 %s1161_s27, %s1156_s28  ;;  %s1013_s7 = sshll.u32 %s1606_s20, 4  ;;  %s2099_s7 = int_to_ptr.vmem [resolvable:$true] %s1013_s7 }
  0x32   : > { %v1254_v36 = vpack.c.bf16 %v821_v34, %v820_v32  ;;  %v823_v37 = vld [vmem:[%s2159_s2 + $0x28] sm:$0xff]  ;;  %v824_v38 = vld [vmem:[%s2159_s2 + $0x30] sm:$0xff]  ;;  %v825_v39 = vld [vmem:[%s2159_s2 + $0x38] sm:$0xff]  ;;  %s1157_s5 = sshll.u32 %s1010_s29, 7  ;;  %s2105_s15 = scalar_lea.sflag [#allocation6], %s156_s4 }
  0x33   : > { %1251 = vmatprep.subr.bf16.mxu0 %v1250_v33  ;;  %1282 = vmatprep.subr.bf16.mxu1 %v1250_v33  ;;  %v826_v40 = vld [vmem:[%s2159_s2 + $0x40] sm:$0xff]  ;;  %v827_v41 = vld [vmem:[%s2159_s2 + $0x48] sm:$0xff]  ;;  %v828_v42 = vld [vmem:[%s2159_s2 + $0x50] sm:$0xff]  ;;  %v1258_v46 = vpack.c.bf16 %v823_v37, %v822_v35  ;;  %v1262_v55 = vpack.c.bf16 %v825_v39, %v824_v38  ;;  %s2097_s9 = scalar_lea.hbm %s2160_s3, %s1157_s5  ;;  %s1371_s16 = scalar_lea.vmem %s2099_s7, 2048 }
  0x34   : > { %1253 = vmatpush3.bf16.msra.mxu0 %v1250_v33  ;;  %1290 = vmatpush3.bf16.msra.mxu1 %v1250_v33  ;;  %v829_v43 = vld [vmem:[%s2159_s2 + $0x58] sm:$0xff]  ;;  %v830_v44 = vld [vmem:[%s2159_s2 + $0x60] sm:$0xff]  ;;  %v831_v45 = vld [vmem:[%s2159_s2 + $0x68] sm:$0xff]  ;;  %v1678_v60 = vpack.c.bf16 %v827_v41, %v826_v40  ;;  %p1372_p12 = scmp.ne.s32.totalorder %s2099_s7, %s1371_s16  ;;  %s1469_s10 = smov [#allocation5]  }
  0x35   : > { %1255 = vmatprep.subr.bf16.mxu0 %v1254_v36  ;;  %1283 = vmatprep.subr.bf16.mxu1 %v1254_v36  ;;  %v832_v47 = vld [vmem:[%s2159_s2 + $0x70] sm:$0xff]  ;;  %v833_v48 = vld [vmem:[%s2159_s2 + $0x78] sm:$0xff]  ;;  %v305_v49 = vld [vmem:[#allocation2] sm:$0xff]  ;;  %v1680_v61 = vpack.c.bf16 %v829_v43, %v828_v42  ;;  %v1688_v2 = vpack.c.bf16 %v831_v45, %v830_v44  ;;  %s1375_s11 = sshll.u32 %s1469_s10, 4  ;;  %s1376_s11 = int_to_ptr.vmem [resolvable:$false] %s1375_s11 }
  0x36   : > { %v1659_v50 = vld [vmem:[%s2158_s1] ss:$0 sm:$0xff]  ;;  %v358_v52 = vld [vmem:[#allocation2 + $0x1] sm:$0xff]  ;;  %v465_v58 = vld [vmem:[#allocation2 + $0x18] sm:$0xff]  ;;  %v1703_v8 = vpack.c.bf16 %v833_v48, %v832_v47  ;;  %p1373_p13 = pnand %p1372_p12, %p1543_p3  ;;  %s1377_s21 = scalar_lea.vmem %s1376_s11, 4096 }
  0x37   : > { %v326_v51 = vmul.f32 %v1659_v50, %v305_v49  ;;  %v1665_v53 = vld [vmem:[%s2158_s1 + $0x1] ss:$0 sm:$0xff]  ;;  %v411_v54 = vld [vmem:[#allocation2 + $0x2] sm:$0xff]  ;;  %v519_v63 = vld [vmem:[#allocation2 + $0x19] sm:$0xff]  ;;  %v328_v11 = vmul.f32 %v1659_v50, %v465_v58  ;;  %p1378_p1 = scmp.lt.s32.totalorder %s2099_s7, %s1376_s11  ;;  %p1379_p2 = scmp.lt.s32.totalorder %s1377_s21, %s1371_s16 }
  0x38   : > { %v379_v56 = vmul.f32 %v1665_v53, %v358_v52  ;;  %v1671_v57 = vld [vmem:[%s2158_s1 + $0x2] ss:$0 sm:$0xff]  ;;  %v1676_v59 = vld [vmem:[%s2158_s1 + $0x4] ss:$0 sm:$0xff]  ;;  %1257 = vmatpush3.bf16.msra.mxu0 %v1254_v36  ;;  %1291 = vmatpush3.bf16.msra.mxu1 %v1254_v36  ;;  %v1686_v0 = vld [vmem:[%s2158_s1 + $0x5] ss:$0 sm:$0xff]  ;;  %v381_v12 = vmul.f32 %v1665_v53, %v519_v63  ;;  %p1374_p0 = pneg %p1373_p13 }
  0x39   : > { %v432_v62 = vmul.f32 %v1671_v57, %v411_v54  ;;  %v572_v1 = vld [vmem:[#allocation2 + $0x1a] sm:$0xff]  ;;  %1259 = vmatprep.subr.bf16.mxu0 %v1258_v46  ;;  %1284 = vmatprep.subr.bf16.mxu1 %v1258_v46  ;;  %v487_v4 = vmul.f32 %v1676_v59, %v465_v58  ;;  %v1694_v5 = vld [vmem:[%s2158_s1 + $0x6] ss:$0 sm:$0xff]  ;;  %v1696_v6 = vld [vmem:[#allocation2 + $0x30] sm:$0xff]  ;;  %v540_v9 = vmul.f32 %v1686_v0, %v519_v63  ;;  %p1380_p4 = por %p1379_p2, %p1378_p1 }
  0x3a   : > { %v395_v3 = vadd.f32 %v379_v56, %v326_v51  ;;  %v1701_v7 = vld [vmem:[%s2158_s1 + $0x8] ss:$0 sm:$0xff]  ;;  %v1709_v10 = vld [vmem:[%s2158_s1 + $0x9] ss:$0 sm:$0xff]  ;;  %v593_v14 = vmul.f32 %v1694_v5, %v572_v1  ;;  %v1716_v16 = vld [vmem:[#allocation2 + $0x31] sm:$0xff]  ;;  %v1723_v19 = vmul.f32 %v1671_v57, %v572_v1  ;;  %v1740_v25 = vmul.f32 %v1676_v59, %v1696_v6 }
  0x3b   : > { %v648_v15 = vmul.f32 %v1701_v7, %v1696_v6  ;;  %v1718_v17 = vld [vmem:[#allocation2 + $0x60] sm:$0xff]  ;;  %v1728_v20 = vld [vmem:[%s2158_s1 + $0xa] ss:$0 sm:$0xff]  ;;  %v1736_v24 = vld [vmem:[#allocation2 + $0x78] sm:$0xff]  ;;  %v701_v27 = vmul.f32 %v1709_v10, %v1716_v16  ;;  %v1752_v35 = vadd.f32 %v381_v12, %v328_v11  ;;  %v1756_v36 = vmul.f32 %v1686_v0, %v1716_v16  ;;  %p1381_p5 = pnand %p1380_p4, %p1374_p0 }
  0x3c   : > { %v448_v13 = vadd.f32 %v432_v62, %v395_v3  ;;  %v1720_v18 = vld [vmem:[#allocation2 + $0x61] sm:$0xff]  ;;  %1261 = vmatpush3.bf16.msra.mxu0 %v1258_v46  ;;  %1292 = vmatpush3.bf16.msra.mxu1 %v1258_v46  ;;  %v334_v21 = vmul.f32 %v1659_v50, %v1718_v17  ;;  %v1744_v28 = vld [vmem:[#allocation2 + $0x32] sm:$0xff]  ;;  %v495_v31 = vmul.f32 %v1676_v59, %v1736_v24  ;;  %v359_v34 = vld [vmem:[#allocation2 + $0x9] sm:$0xff] }
  0x3d   : > { %v387_v22 = vmul.f32 %v1665_v53, %v1720_v18  ;;  %v1734_v23 = vld [vmem:[#allocation2 + $0x62] sm:$0xff]  ;;  %1263 = vmatprep.subr.bf16.mxu0 %v1262_v55  ;;  %1285 = vmatprep.subr.bf16.mxu1 %v1262_v55  ;;  %v1750_v32 = vld [vmem:[#allocation2 + $0x79] sm:$0xff]  ;;  %v754_v38 = vmul.f32 %v1728_v20, %v1744_v28  ;;  %v412_v41 = vld [vmem:[#allocation2 + $0xa] sm:$0xff]  ;;  %v380_v46 = vmul.f32 %v1665_v53, %v359_v34 }
  0x3e   : > { %v503_v26 = vadd.f32 %v487_v4, %v448_v13  ;;  %v440_v29 = vmul.f32 %v1671_v57, %v1734_v23  ;;  %v306_v33 = vld [vmem:[#allocation2 + $0x8] sm:$0xff]  ;;  %v548_v39 = vmul.f32 %v1686_v0, %v1750_v32  ;;  %v1763_v42 = vld [vmem:[#allocation2 + $0x20] sm:$0xff]  ;;  %v1767_v45 = vld [vmem:[#allocation2 + $0x90] sm:$0xff]  ;;  %v433_v47 = vmul.f32 %v1671_v57, %v412_v41 }
  0x3f   : > { %v403_v30 = vadd.f32 %v387_v22, %v334_v21  ;;  %v327_v40 = vmul.f32 %v1659_v50, %v306_v33  ;;  %v1765_v44 = vld [vmem:[#allocation2 + $0x7a] sm:$0xff]  ;;  %v656_v51 = vmul.f32 %v1701_v7, %v1767_v45  ;;  %v1777_v52 = vld [vmem:[#allocation2 + $0x91] sm:$0xff]  ;;  %v1779_v54 = vld [vmem:[#allocation2 + $0x68] sm:$0xff]  ;;  %v488_v1 = vmul.f32 %v1676_v59, %v1763_v42 }
  0x40   : > { %v556_v37 = vadd.f32 %v540_v9, %v503_v26  ;;  %1265 = vmatpush3.bf16.msra.mxu0 %v1262_v55  ;;  %1293 = vmatpush3.bf16.msra.mxu1 %v1262_v55  ;;  %v601_v49 = vmul.f32 %v1694_v5, %v1765_v44  ;;  %v1781_v55 = vld [vmem:[#allocation2 + $0x69] sm:$0xff]  ;;  %v709_v58 = vmul.f32 %v1709_v10, %v1777_v52  ;;  %v1785_v62 = vld [vmem:[#allocation2 + $0x92] sm:$0xff]  ;;  %v1789_v3 = vld [vmem:[#allocation2 + $0x21] sm:$0xff] }
  0x41   : > { %v456_v43 = vadd.f32 %v440_v29, %v403_v30  ;;  %1267 = vmatprep.subr.bf16.mxu0 %v1678_v60  ;;  %1286 = vmatprep.subr.bf16.mxu1 %v1678_v60  ;;  %v396_v63 = vadd.f32 %v380_v46, %v327_v40  ;;  %v1791_v4 = vld [vmem:[#allocation2 + $0x6a] sm:$0xff]  ;;  %v762_v11 = vmul.f32 %v1728_v20, %v1785_v62  ;;  %v1803_v26 = vld [vmem:[#allocation2 + $0x22] sm:$0xff]  ;;  %v1813_v34 = vld [vmem:[#allocation2 + $0x38] sm:$0xff] }
  0x42   : > { %v609_v48 = vadd.f32 %v593_v14, %v556_v37  ;;  %v541_v12 = vmul.f32 %v1686_v0, %v1789_v3  ;;  %v335_v13 = vmul.f32 %v1659_v50, %v1779_v54  ;;  %v1799_v14 = vld [vmem:[#allocation2 + $0x80] sm:$0xff]  ;;  %v594_v30 = vmul.f32 %v1694_v5, %v1803_v26 }
  0x43   : > { %v511_v56 = vadd.f32 %v495_v31, %v456_v43  ;;  %v449_v22 = vadd.f32 %v433_v47, %v396_v63  ;;  %v441_v31 = vmul.f32 %v1671_v57, %v1791_v4  ;;  %v1815_v37 = vld [vmem:[#allocation2 + $0x39] sm:$0xff]  ;;  %v496_v40 = vmul.f32 %v1676_v59, %v1799_v14  ;;  %v1819_v41 = vld [vmem:[#allocation2 + $0x81] sm:$0xff] }
  0x44   : > { %v664_v9 = vadd.f32 %v648_v15, %v609_v48  ;;  %1269 = vmatpush3.bf16.msra.mxu0 %v1678_v60  ;;  %1294 = vmatpush3.bf16.msra.mxu1 %v1678_v60  ;;  %v388_v15 = vmul.f32 %v1665_v53, %v1781_v55  ;;  %v702_v46 = vmul.f32 %v1709_v10, %v1815_v37 }
  0x45   : > { %v564_v21 = vadd.f32 %v548_v39, %v511_v56  ;;  %1271 = vmatprep.subr.bf16.mxu0 %v1680_v61  ;;  %1287 = vmatprep.subr.bf16.mxu1 %v1680_v61  ;;  %v504_v60 = vadd.f32 %v488_v1, %v449_v22  ;;  %v549_v47 = vmul.f32 %v1686_v0, %v1819_v41  ;;  %v1829_v56 = vld [vmem:[#allocation2 + $0x3a] sm:$0xff]  ;;  %v1831_v1 = vld [vmem:[#allocation2 + $0x82] sm:$0xff] }
  0x46   : > { %v717_v29 = vadd.f32 %v701_v27, %v664_v9  ;;  %v404_v39 = vadd.f32 %v388_v15, %v335_v13  ;;  %v649_v27 = vmul.f32 %v1701_v7, %v1813_v34  ;;  %2164 = vst [vmem:[#allocation10_spill] sm:$0xff] %v1831_v1  ;;  %v602_v9 = vmul.f32 %v1694_v5, %v1831_v1  ;;  %v1839_v13 = vld [vmem:[#allocation2 + $0x98] sm:$0xff]  ;;  %v1845_v15 = vld [vmem:[#allocation2 + $0x48] sm:$0xff] }
  0x47   : > { %v617_v33 = vadd.f32 %v601_v49, %v564_v21  ;;  %v557_v49 = vadd.f32 %v541_v12, %v504_v60  ;;  %v657_v22 = vmul.f32 %v1701_v7, %v1839_v13  ;;  %v1860_v60 = vld [vmem:[#allocation2 + $0x9a] sm:$0xff] }
  0x48   : > { %v770_v43 = vadd.f32 %v754_v38, %v717_v29  ;;  %1273 = vmatpush3.bf16.msra.mxu0 %v1680_v61  ;;  %1295 = vmatpush3.bf16.msra.mxu1 %v1680_v61  ;;  %v457_v63 = vadd.f32 %v441_v31, %v404_v39  ;;  %v755_v38 = vmul.f32 %v1728_v20, %v1829_v56 }
  0x49   : > { %v672_v48 = vadd.f32 %v656_v51, %v617_v33  ;;  %1275 = vmatprep.subr.bf16.mxu0 %v1688_v2  ;;  %1288 = vmatprep.subr.bf16.mxu1 %v1688_v2  ;;  %v450_v61 = vadd.f32 %v1723_v19, %v1752_v35  ;;  %v610_v12 = vadd.f32 %v594_v30, %v557_v49 }
  0x4a   : > { %1226 = vmatprep.mubr.f32.mxu0 %v770_v43  ;;  %v512_v21 = vadd.f32 %v496_v40, %v457_v63  ;;  %v595_v31 = vmul.f32 %v1694_v5, %v1744_v28  ;;  %v650_v33 = vmul.f32 %v1701_v7, %v1845_v15  ;;  %v336_v19 = vmul.f32 %v1659_v50, %v1736_v24  ;;  %v1875_v63 = vld [vmem:[#allocation2 + $0x4a] sm:$0xff] }
  0x4b   : > { %v725_v51 = vadd.f32 %v709_v58, %v672_v48  ;;  %v505_v29 = vadd.f32 %v1740_v25, %v450_v61  ;;  %v665_v58 = vadd.f32 %v649_v27, %v610_v12  ;;  %v1858_v25 = vld [vmem:[#allocation2 + $0x99] sm:$0xff]  ;;  %v389_v40 = vmul.f32 %v1665_v53, %v1750_v32  ;;  %v1871_v48 = vld [vmem:[#allocation2 + $0x49] sm:$0xff] }
  0x4c   : > { %1277 = vmatpush3.bf16.msra.mxu0 %v1688_v2  ;;  %1296 = vmatpush3.bf16.msra.mxu1 %v1688_v2  ;;  %v565_v30 = vadd.f32 %v549_v47, %v512_v21  ;;  %v442_v43 = vmul.f32 %v1671_v57, %v1765_v44  ;;  %v710_v27 = vmul.f32 %v1709_v10, %v1858_v25 }
  0x4d   : > { %v778_v35 = vadd.f32 %v762_v11, %v725_v51  ;;  %1279 = vmatprep.subr.bf16.mxu0 %v1703_v8  ;;  %1289 = vmatprep.subr.bf16.mxu1 %v1703_v8  ;;  %v558_v39 = vadd.f32 %v1756_v36, %v505_v29  ;;  %v718_v2 = vadd.f32 %v702_v46, %v665_v58 }
  0x4e   : > { %v618_v11 = vadd.f32 %v602_v9, %v565_v30  ;;  %v763_v47 = vmul.f32 %v1728_v20, %v1860_v60  ;;  %v703_v36 = vmul.f32 %v1709_v10, %v1871_v48  ;;  %v405_v61 = vadd.f32 %v389_v40, %v336_v19  ;;  %v1893_v30 = vld [vmem:[#allocation2 + $0xa8] sm:$0xff] }
  0x4f   : > { %1238 = vmatprep.mubr.f32.mxu1 %v778_v35  ;;  %v611_v49 = vadd.f32 %v595_v31, %v558_v39  ;;  %v497_v51 = vmul.f32 %v1676_v59, %v1767_v45  ;;  %v771_v46 = vadd.f32 %v755_v38, %v718_v2  ;;  %v756_v12 = vmul.f32 %v1728_v20, %v1875_v63 }
  0x50   : > { %1281 = vmatpush3.bf16.msra.mxu0 %v1703_v8  ;;  %1297 = vmatpush3.bf16.msra.mxu1 %v1703_v8  ;;  %v673_v9 = vadd.f32 %v657_v22, %v618_v11  ;;  %v458_v29 = vadd.f32 %v442_v43, %v405_v61  ;;  %v550_v31 = vmul.f32 %v1686_v0, %v1777_v52  ;;  %v1909_v61 = vld [vmem:[#allocation2 + $0x50] sm:$0xff] }
  0x51   : > { %v666_v21 = vadd.f32 %v650_v33, %v611_v49  ;;  %v329_v19 = vmul.f32 %v1659_v50, %v1763_v42  ;;  %v382_v58 = vmul.f32 %v1665_v53, %v1789_v3  ;;  %v435_v8 = vmul.f32 %v1671_v57, %v1803_v26  ;;  %v1897_v42 = vld [vmem:[#allocation2 + $0xa9] sm:$0xff] }
  0x52   : > { %v726_v35 = vadd.f32 %v710_v27, %v673_v9  ;;  %v513_v22 = vadd.f32 %v497_v51, %v458_v29  ;;  %v603_v33 = vmul.f32 %v1694_v5, %v1785_v62  ;;  %v658_v40 = vmul.f32 %v1701_v7, %v1893_v30  ;;  %v1905_v49 = vld [vmem:[#allocation2 + $0xaa] sm:$0xff] }
  0x53   : > { %1227 = vmatmul.mubr.f32.vlgmr.msra.gmra.mrb[0].mxu0 %v771_v46  ;;  %v719_v38 = vadd.f32 %v703_v36, %v666_v21  ;;  %v398_v43 = vadd.f32 %v382_v58, %v329_v19  ;;  %v490_v3 = vmul.f32 %v1676_v59, %v1813_v34  ;;  %v711_v11 = vmul.f32 %v1709_v10, %v1897_v42 }
  0x54   : > { %v779_v39 = vadd.f32 %v763_v47, %v726_v35  ;;  %v566_v26 = vadd.f32 %v550_v31, %v513_v22  ;;  %v337_v27 = vmul.f32 %v1659_v50, %v1799_v14  ;;  %v543_v36 = vmul.f32 %v1686_v0, %v1815_v37  ;;  %v1921_v31 = vld [vmem:[#allocation2 + $0x51] sm:$0xff] }
  0x55   : > { %v772_v2 = vadd.f32 %v756_v12, %v719_v38  ;;  %v451_v47 = vadd.f32 %v435_v8, %v398_v43  ;;  %v390_v51 = vmul.f32 %v1665_v53, %v1819_v41  ;;  %v443_v46 = vmul.f32 %v1671_v57, %v1831_v1  ;;  %v1927_v22 = vld [vmem:[#allocation2 + $0x52] sm:$0xff] }
  0x56   : > { %1239 = vmatmul.mubr.f32.vlgmr.msra.gmra.mrb[0].mxu1 %v779_v39  ;;  %v619_v9 = vadd.f32 %v603_v33, %v566_v26  ;;  %v764_v12 = vmul.f32 %v1728_v20, %v1905_v49  ;;  %v596_v21 = vmul.f32 %v1694_v5, %v1829_v56  ;;  %v651_v29 = vmul.f32 %v1701_v7, %v1909_v61 }
  0x57   : > { %1229 = vmatprep.mubr.f32.mxu0 %v772_v2  ;;  %v506_v19 = vadd.f32 %v490_v3, %v451_v47  ;;  %v704_v35 = vmul.f32 %v1709_v10, %v1921_v31  ;;  %v406_v58 = vadd.f32 %v390_v51, %v337_v27  ;;  %v498_v8 = vmul.f32 %v1676_v59, %v1839_v13  ;;  %v1941_v51 = vld [vmem:[#allocation2 + $0xb0] sm:$0xff] }
  0x58   : > { %v674_v38 = vadd.f32 %v658_v40, %v619_v9  ;;  %v330_v33 = vmul.f32 %v1659_v50, %v1696_v6  ;;  %v383_v39 = vmul.f32 %v1665_v53, %v1716_v16  ;;  %v436_v43 = vmul.f32 %v1671_v57, %v1744_v28 }
  0x59   : > { %v559_v3 = vadd.f32 %v543_v36, %v506_v19  ;;  %v757_v2 = vmul.f32 %v1728_v20, %v1927_v22  ;;  %v459_v26 = vadd.f32 %v443_v46, %v406_v58  ;;  %v551_v27 = vmul.f32 %v1686_v0, %v1858_v25  ;;  %v1949_v58 = vld [vmem:[#allocation2 + $0xb1] sm:$0xff] }
  0x5a   : > { %v727_v40 = vadd.f32 %v711_v11, %v674_v38  ;;  %v604_v47 = vmul.f32 %v1694_v5, %v1860_v60  ;;  %v399_v6 = vadd.f32 %v383_v39, %v330_v33  ;;  %v491_v16 = vmul.f32 %v1676_v59, %v1845_v15 }
  0x5b   : > { %v612_v9 = vadd.f32 %v596_v21, %v559_v3  ;;  %v514_v28 = vadd.f32 %v498_v8, %v459_v26  ;;  %v659_v36 = vmul.f32 %v1701_v7, %v1941_v51  ;;  %v544_v46 = vmul.f32 %v1686_v0, %v1871_v48  ;;  %v1959_v3 = vld [vmem:[#allocation2 + $0xb2] sm:$0xff] }
  0x5c   : > { %v780_v19 = vadd.f32 %v764_v12, %v727_v40  ;;  %v452_v11 = vadd.f32 %v436_v43, %v399_v6  ;;  %v338_v38 = vmul.f32 %v1659_v50, %v1767_v45  ;;  %v391_v33 = vmul.f32 %v1665_v53, %v1777_v52 }
  0x5d   : > { %v667_v39 = vadd.f32 %v651_v29, %v612_v9  ;;  %v567_v1 = vadd.f32 %v551_v27, %v514_v28  ;;  %v712_v21 = vmul.f32 %v1709_v10, %v1949_v58  ;;  %v444_v8 = vmul.f32 %v1671_v57, %v1785_v62 }
  0x5e   : > { %1241 = vmatprep.mubr.f32.mxu1 %v780_v19  ;;  %v507_v12 = vadd.f32 %v491_v16, %v452_v11  ;;  %v597_v43 = vmul.f32 %v1694_v5, %v1875_v63  ;;  %v407_v26 = vadd.f32 %v391_v33, %v338_v38  ;;  %v499_v45 = vmul.f32 %v1676_v59, %v1893_v30 }
  0x5f   : > { %v720_v52 = vadd.f32 %v704_v35, %v667_v39  ;;  %v620_v29 = vadd.f32 %v604_v47, %v567_v1  ;;  %v765_v27 = vmul.f32 %v1728_v20, %v1959_v3  ;;  %v652_v40 = vmul.f32 %v1701_v7, %v1718_v17 }
  0x60   : > { %v560_v62 = vadd.f32 %v544_v46, %v507_v12  ;;  %v460_v6 = vadd.f32 %v444_v8, %v407_v26  ;;  %v552_v16 = vmul.f32 %v1686_v0, %v1897_v42  ;;  %v331_v9 = vmul.f32 %v1659_v50, %v1813_v34  ;;  %v692_v26 = vld [vmem:[#allocation2 + $0xc1] sm:$0xff] }
  0x61   : > { %v773_v28 = vadd.f32 %v757_v2, %v720_v52  ;;  %v675_v19 = vadd.f32 %v659_v36, %v620_v29  ;;  %v384_v35 = vmul.f32 %v1665_v53, %v1815_v37  ;;  %v437_v1 = vmul.f32 %v1671_v57, %v1829_v56  ;;  %v638_v2 = vld [vmem:[#allocation2 + $0xc0] sm:$0xff] }
  0x62   : > { %v613_v47 = vadd.f32 %v597_v43, %v560_v62  ;;  %v705_v11 = vmul.f32 %v1709_v10, %v1720_v18  ;;  %v515_v46 = vadd.f32 %v499_v45, %v460_v6  ;;  %v605_v38 = vmul.f32 %v1694_v5, %v1905_v49 }
  0x63   : > { %1230 = vmatmul.mubr.f32.gmra.mrb[2].mxu0 %v773_v28  ;;  %v728_v33 = vadd.f32 %v712_v21, %v675_v19  ;;  %v758_v34 = vmul.f32 %v1728_v20, %v1734_v23  ;;  %v400_v36 = vadd.f32 %v384_v35, %v331_v9  ;;  %v492_v37 = vmul.f32 %v1676_v59, %v1909_v61 }
  0x64   : > { %v668_v39 = vadd.f32 %v652_v40, %v613_v47  ;;  %v568_v56 = vadd.f32 %v552_v16, %v515_v46  ;;  %v660_v8 = vmul.f32 %v1701_v7, %v638_v2  ;;  %v545_v12 = vmul.f32 %v1686_v0, %v1921_v31  ;;  %v745_v16 = vld [vmem:[#allocation2 + $0xc2] sm:$0xff] }
  0x65   : > { %v781_v43 = vadd.f32 %v765_v27, %v728_v33  ;;  %v453_v45 = vadd.f32 %v437_v1, %v400_v36  ;;  %v339_v21 = vmul.f32 %v1659_v50, %v1839_v13  ;;  %v392_v52 = vmul.f32 %v1665_v53, %v1858_v25 }
  0x66   : > { %v721_v29 = vadd.f32 %v705_v11, %v668_v39  ;;  %v621_v62 = vadd.f32 %v605_v38, %v568_v56  ;;  %v713_v6 = vmul.f32 %v1709_v10, %v692_v26  ;;  %v445_v40 = vmul.f32 %v1671_v57, %v1860_v60 }
  0x67   : > { %1242 = vmatmul.mubr.f32.gmra.mrb[2].mxu1 %v781_v43  ;;  %v508_v9 = vadd.f32 %v492_v37, %v453_v45  ;;  %v598_v27 = vmul.f32 %v1694_v5, %v1927_v22  ;;  %v408_v28 = vadd.f32 %v392_v52, %v339_v21  ;;  %v500_v13 = vmul.f32 %v1676_v59, %v1941_v51  ;;  %v693_v45 = vld [vmem:[#allocation2 + $0xc9] sm:$0xff] }
  0x68   : > { %v774_v19 = vadd.f32 %v758_v34, %v721_v29  ;;  %v676_v35 = vadd.f32 %v660_v8, %v621_v62  ;;  %v766_v25 = vmul.f32 %v1728_v20, %v745_v16  ;;  %v653_v1 = vmul.f32 %v1701_v7, %v1779_v54 }
  0x69   : > { %v561_v47 = vadd.f32 %v545_v12, %v508_v9  ;;  %v461_v11 = vadd.f32 %v445_v40, %v408_v28  ;;  %v553_v60 = vmul.f32 %v1686_v0, %v1949_v58  ;;  %v332_v46 = vmul.f32 %v1659_v50, %v1845_v15  ;;  %v639_v15 = vld [vmem:[#allocation2 + $0xc8] sm:$0xff] }
  0x6a   : > { %1232 = vmatprep.mubr.f32.mxu0 %v774_v19  ;;  %v729_v38 = vadd.f32 %v713_v6, %v676_v35  ;;  %v706_v33 = vmul.f32 %v1709_v10, %v1781_v55  ;;  %v385_v34 = vmul.f32 %v1665_v53, %v1871_v48  ;;  %v438_v36 = vmul.f32 %v1671_v57, %v1875_v63  ;;  %v2022_v6 = vld [vmem:[#allocation2 + $0xca] sm:$0xff] }
  0x6b   : > { %v614_v37 = vadd.f32 %v598_v27, %v561_v47  ;;  %v759_v39 = vmul.f32 %v1728_v20, %v1791_v4  ;;  %v516_v56 = vadd.f32 %v500_v13, %v461_v11  ;;  %v606_v8 = vmul.f32 %v1694_v5, %v1959_v3 }
  0x6c   : > { %v782_v12 = vadd.f32 %v766_v25, %v729_v38  ;;  %v661_v43 = vmul.f32 %v1701_v7, %v639_v15  ;;  %v401_v21 = vadd.f32 %v385_v34, %v332_v46  ;;  %v493_v48 = vmul.f32 %v1676_v59, %v1718_v17  ;;  %v640_v38 = vld [vmem:[#allocation2 + $0xd8] sm:$0xff] }
  0x6d   : > { %v669_v52 = vadd.f32 %v653_v1, %v614_v37  ;;  %v569_v29 = vadd.f32 %v553_v60, %v516_v56  ;;  %v714_v63 = vmul.f32 %v1709_v10, %v693_v45  ;;  %v340_v62 = vmul.f32 %v1659_v50, %v1893_v30  ;;  %v694_v37 = vld [vmem:[#allocation2 + $0xd9] sm:$0xff] }
  0x6e   : > { %1244 = vmatprep.mubr.f32.mxu1 %v782_v12  ;;  %v454_v40 = vadd.f32 %v438_v36, %v401_v21  ;;  %v546_v9 = vmul.f32 %v1686_v0, %v1720_v18  ;;  %v393_v27 = vmul.f32 %v1665_v53, %v1897_v42  ;;  %v446_v17 = vmul.f32 %v1671_v57, %v1905_v49 }
  0x6f   : > { %v722_v28 = vadd.f32 %v706_v33, %v669_v52  ;;  %v622_v13 = vadd.f32 %v606_v8, %v569_v29  ;;  %v767_v19 = vmul.f32 %v1728_v20, %v2022_v6  ;;  %v599_v30 = vmul.f32 %v1694_v5, %v1734_v23 }
  0x70   : > { %v509_v35 = vadd.f32 %v493_v48, %v454_v40  ;;  %v654_v25 = vmul.f32 %v1701_v7, %v1736_v24  ;;  %v409_v1 = vadd.f32 %v393_v27, %v340_v62  ;;  %v501_v18 = vmul.f32 %v1676_v59, %v638_v2 }
  0x71   : > { %v775_v47 = vadd.f32 %v759_v39, %v722_v28  ;;  %v677_v42 = vadd.f32 %v661_v43, %v622_v13  ;;  %v554_v11 = vmul.f32 %v1686_v0, %v692_v26  ;;  %v333_v49 = vmul.f32 %v1659_v50, %v1909_v61  ;;  %v747_v43 = vld [vmem:[#allocation2 + $0xda] sm:$0xff]  ;;  %v2165_v13 = vld [vmem:[#allocation10_spill] sm:$0xff] }
  0x72   : > { %v562_v60 = vadd.f32 %v546_v9, %v509_v35  ;;  %v462_v46 = vadd.f32 %v446_v17, %v409_v1  ;;  %v386_v23 = vmul.f32 %v1665_v53, %v1921_v31  ;;  %v439_v33 = vmul.f32 %v1671_v57, %v1927_v22 }
  0x73   : > { %1233 = vmatmul.mubr.f32.gmra.mrb[4].mxu0 %v775_v47  ;;  %v730_v24 = vadd.f32 %v714_v63, %v677_v42  ;;  %v707_v2 = vmul.f32 %v1709_v10, %v1750_v32  ;;  %v760_v26 = vmul.f32 %v1728_v20, %v1765_v44  ;;  %v607_v34 = vmul.f32 %v1694_v5, %v745_v16 }
  0x74   : > { %v615_v61 = vadd.f32 %v599_v30, %v562_v60  ;;  %v517_v36 = vadd.f32 %v501_v18, %v462_v46  ;;  %v402_v39 = vadd.f32 %v386_v23, %v333_v49  ;;  %v494_v31 = vmul.f32 %v1676_v59, %v1779_v54 }
  0x75   : > { %v783_v56 = vadd.f32 %v767_v19, %v730_v24  ;;  %v662_v22 = vmul.f32 %v1701_v7, %v640_v38  ;;  %v547_v8 = vmul.f32 %v1686_v0, %v1781_v55  ;;  %v341_v32 = vmul.f32 %v1659_v50, %v1941_v51  ;;  %v695_v19 = vld [vmem:[#allocation2 + $0xe1] sm:$0xff] }
  0x76   : > { %v670_v12 = vadd.f32 %v654_v25, %v615_v61  ;;  %v570_v44 = vadd.f32 %v554_v11, %v517_v36  ;;  %v455_v16 = vadd.f32 %v439_v33, %v402_v39  ;;  %v394_v21 = vmul.f32 %v1665_v53, %v1949_v58 }
  0x77   : > { %1245 = vmatmul.mubr.f32.gmra.mrb[4].mxu1 %v783_v56  ;;  %v715_v48 = vmul.f32 %v1709_v10, %v694_v37  ;;  %v600_v54 = vmul.f32 %v1694_v5, %v1791_v4  ;;  %v447_v52 = vmul.f32 %v1671_v57, %v1959_v3  ;;  %v502_v55 = vmul.f32 %v1676_v59, %v639_v15  ;;  %v641_v3 = vld [vmem:[#allocation2 + $0xe0] sm:$0xff] }
  0x78   : > { %v723_v29 = vadd.f32 %v707_v2, %v670_v12  ;;  %v623_v50 = vadd.f32 %v607_v34, %v570_v44  ;;  %v510_v51 = vadd.f32 %v494_v31, %v455_v16  ;;  %v410_v63 = vadd.f32 %v394_v21, %v341_v32 }
  0x79   : > { %v768_v62 = vmul.f32 %v1728_v20, %v747_v43  ;;  %v655_v53 = vmul.f32 %v1701_v7, %v1799_v14  ;;  %v555_v58 = vmul.f32 %v1686_v0, %v693_v45  ;;  %v708_v57 = vmul.f32 %v1709_v10, %v1819_v41  ;;  %v748_v41 = vld [vmem:[#allocation2 + $0xe2] sm:$0xff] }
  0x7a   : > { %v776_v40 = vadd.f32 %v760_v26, %v723_v29  ;;  %v678_v9 = vadd.f32 %v662_v22, %v623_v50  ;;  %v563_v27 = vadd.f32 %v547_v8, %v510_v51  ;;  %v463_v4 = vadd.f32 %v447_v52, %v410_v63 }
  0x7b   : > { %v608_v28 = vmul.f32 %v1694_v5, %v2022_v6  ;;  %v761_v14 = vmul.f32 %v1728_v20, %v2165_v13  ;;  %v663_v35 = vmul.f32 %v1701_v7, %v641_v3  ;;  %v716_v18 = vmul.f32 %v1709_v10, %v695_v19 }
  0x7c   : > { %1235 = vmatprep.mubr.f32.mxu0 %v776_v40  ;;  %v731_v59 = vadd.f32 %v715_v48, %v678_v9  ;;  %v616_v15 = vadd.f32 %v600_v54, %v563_v27  ;;  %v518_v17 = vadd.f32 %v502_v55, %v463_v4  ;;  %v769_v47 = vmul.f32 %v1728_v20, %v748_v41 }
  0x7e   : > { %v784_v0 = vadd.f32 %v768_v62, %v731_v59  ;;  %v671_v45 = vadd.f32 %v655_v53, %v616_v15  ;;  %v571_v30 = vadd.f32 %v555_v58, %v518_v17 }
  0x80   : > { %1247 = vmatprep.mubr.f32.mxu1 %v784_v0  ;;  %v724_v25 = vadd.f32 %v708_v57, %v671_v45  ;;  %v624_v1 = vadd.f32 %v608_v28, %v571_v30 }
  0x82   : > { %v777_v5 = vadd.f32 %v761_v14, %v724_v25  ;;  %v679_v6 = vadd.f32 %v663_v35, %v624_v1 }
  0x84   : > { %1236 = vmatmul.mubr.f32.gmra.mrb[6].mxu0 %v777_v5  ;;  %v732_v42 = vadd.f32 %v716_v18, %v679_v6 }
  0x86   : > { %v785_v11 = vadd.f32 %v769_v47, %v732_v42 }
  0x88   : > { %1248 = vmatmul.mubr.f32.gmra.mrb[6].mxu1 %v785_v11 }
 0x126   : > { %v1228_v7 = vpop.f32.mrb[0].mxu0 }
 0x127   : > { %980 = vst [vmem:[%s1606_s20 + $0x8] sm:$0xff] %v1228_v7  ;;  %v900_v49 = vpop.f32.mrb[1].mxu0 }
 0x128   : > { %979 = vst [vmem:[%s1606_s20] sm:$0xff] %v900_v49 }
 0x129   : > { %v1240_v60 = vpop.f32.mrb[0].mxu1 }
 0x12a   : > { %988 = vst [vmem:[%s1606_s20 + $0x48] sm:$0xff] %v1240_v60  ;;  %v940_v10 = vpop.f32.mrb[1].mxu1 }
 0x12b   : > { %987 = vst [vmem:[%s1606_s20 + $0x40] sm:$0xff] %v940_v10 }
 0x136   : > { %v1231_v20 = vpop.f32.mrb[2].mxu0 }
 0x137   : > { %982 = vst [vmem:[%s1606_s20 + $0x18] sm:$0xff] %v1231_v20  ;;  %v910_v46 = vpop.f32.mrb[3].mxu0 }
 0x138   : > { %981 = vst [vmem:[%s1606_s20 + $0x10] sm:$0xff] %v910_v46 }
 0x13a   : > { %v1243_v38 = vpop.f32.mrb[2].mxu1 }
 0x13b   : > { %990 = vst [vmem:[%s1606_s20 + $0x58] sm:$0xff] %v1243_v38  ;;  %v950_v23 = vpop.f32.mrb[3].mxu1 }
 0x13c   : > { %989 = vst [vmem:[%s1606_s20 + $0x50] sm:$0xff] %v950_v23 }
 0x146   : > { %v1234_v33 = vpop.f32.mrb[4].mxu0 }
 0x147   : > { %984 = vst [vmem:[%s1606_s20 + $0x28] sm:$0xff] %v1234_v33  ;;  %v920_v24 = vpop.f32.mrb[5].mxu0 }
 0x148   : > { %983 = vst [vmem:[%s1606_s20 + $0x20] sm:$0xff] %v920_v24 }
 0x14a   : > { %v1246_v2 = vpop.f32.mrb[4].mxu1 }
 0x14b   : > { %992 = vst [vmem:[%s1606_s20 + $0x68] sm:$0xff] %v1246_v2  ;;  %v960_v26 = vpop.f32.mrb[5].mxu1 }
 0x14c   : > { %991 = vst [vmem:[%s1606_s20 + $0x60] sm:$0xff] %v960_v26 }
 0x157   : > { %v1237_v34 = vpop.f32.mrb[6].mxu0 }
 0x158   : > { %986 = vst [vmem:[%s1606_s20 + $0x38] sm:$0xff] %v1237_v34  ;;  %v930_v61 = vpop.f32.mrb[7].mxu0 }
 0x159   : > { %985 = vst [vmem:[%s1606_s20 + $0x30] sm:$0xff] %v930_v61 }
 0x15b   : > { %v1249_v36 = vpop.f32.mrb[6].mxu1 }
 0x15c   : > { %994 = vst [vmem:[%s1606_s20 + $0x78] sm:$0xff] %v1249_v36  ;;  %v970_v37 = vpop.f32.mrb[7].mxu1 }
 0x15d   : > { %993 = vst [vmem:[%s1606_s20 + $0x70] sm:$0xff] %v970_v37 }
 0x15e   : > { %1384 = shalt.err (!%p1381_p5)
}
 0x15f   : > { %s1385_s4 = scalar_lea.hbm %s2097_s9, 2048  ;;  %s1389_s27 = scalar_lea.hbm %s2160_s3, 8192 }
 0x160   : > { %p1386_p6 = scmp.ne.s32.totalorder %s2097_s9, %s1385_s4  ;;  %p1390_p10 = scmp.lt.u32.totalorder %s2097_s9, %s2160_s3 }
 0x161   : > { %p1391_p11 = scmp.lt.u32.totalorder %s1389_s27, %s1385_s4  ;;  %p1393_p13 = scmp.lt.u32.totalorder %s1385_s4, %s2097_s9 }
 0x162   : > { %p1387_p7 = pnand %p1386_p6, %p1543_p3 }
 0x163   : > { %p1392_p12 = por %p1391_p11, %p1390_p10 }
 0x164   : > { %p1388_p9 = pneg %p1387_p7 }
 0x165   : > { %p1394_p0 = por %p1393_p13, %p1392_p12 }
 0x167   : > { %p1395_p1 = pnand %p1394_p0, %p1388_p9 }
 0x169   : > { %1398 = shalt.err (!%p1395_p1)
}
 0x16a   : > { %s1470_s5 = smov 128   ;;  %s1471_s8 = smov 8  }
 0x16b   : > { %1298 = dma.vmem_to_hbm [thread:$0]  (%p1543_p3), %s2099_s7, 2048, %s2097_s9, %s2105_s15, %s1470_s5, %s1470_s5, %s1471_s8  }
 0x16c PF: > { %p1304_p2 = scmp.ge.s32.totalorder %s1467_s19, 2  ;;  %s1028_s6 = sand.u32 1, %s1439_s12  }
 0x16d   : > { %s1029_s16 = scalar_lea.sflag [#allocation6], %s1028_s6 }
 0x16e   : > { %p1301_p4 = pnand %p1304_p2, %p1552_p8 }
 0x170   : > { %1434 = dma.done.wait (!%p1301_p4), %s1029_s16, 2048  }
 0x171   : > { %1436 = vsyncadd (!%p1301_p4), %s1029_s16, 4294965248  ;;  %s16_s19 = sadd.s32 1, %s1467_s19   ;;  %s2166_s12 = smov %s1443_s13 }
 0x172   : > { %p13_p5 = scmp.ge.s32.totalorder %s16_s19, 6   ;;  %s2167_s13 = smov %s1447_s14 }
 0x173   : > { %s2168_s14 = smov %s1561_s30  ;;  %s2169_s15 = smov %s1459_s17 }
 0x174   : > { %s2170_s16 = smov %s1463_s18  ;;  %s2171_s17 = smov %s2174_s22 }
 0x175   : > { %s2172_s18 = smov %s2178_s23  ;;  %15 = sbr.rel (!%p13_p5) target bundleno = 5 (0x5), region = 123 }
 0x17c   :  { %1034 = vsyncpa [#allocation6], 1 }
 0x17d   :  { %1036 = vsyncpa [#allocation6 + $0x1], 1 }
 0x17e   :  { %1037 = vsyncmov [#allocation4] }
 0x181   :  { %s1038_s25 = vpop.sfrf %1037 }
 0x182   :  { %p1160_p3 = scmp.ne.s32.totalorder %s1038_s25, 0 }
 0x184   :  { %1042 = shalt.err (%p1160_p3)  }

</bundles_post_ra>
